<compile_context>
chip_gen: v7x
topology: tpu7x:2x2x1
jax: 0.10.0
libtpu: 0.0.40
codegen_flags: <defaults>
</compile_context>

<pallas_src>
import jax
import jax.numpy as jnp
from jax.experimental import pallas as pl
from jax.experimental.pallas import tpu as pltpu


def _round_up(x, m):
    return ((x + m - 1) // m) * m


def _cdiv(a, b):
    return (a + b - 1) // b


def _mlp_kernel(x_ref, w1_ref, b1_ref, w2_ref, b2_ref, w3_ref, b3_ref, z_ref):
    """One batch tile of the InferenceNetwork forward pass.

    x_ref:  (bt, n)        native input dtype (cast to compute dtype in-VMEM)
    w1_ref: (n, hp)   cdt  b1_ref: (1, hp)       f32
    w2_ref: (hp, hp)  cdt  b2_ref: (1, hp)       f32
    w3_ref: (hp, od)  cdt  b3_ref: (1, od)       f32
    z_ref:  (bt, od)  f32  fused [mu | logstd], od = 2*latent_dim.
    """
    cdt = w1_ref.dtype
    x = x_ref[...].astype(cdt)  # in-kernel cast: no wrapper HBM pass

    # layer 1: Linear(n, hidden) + tanh   (f32 accumulation, f32 bias/tanh)
    h = jnp.tanh(
        jnp.dot(x, w1_ref[...], preferred_element_type=jnp.float32) + b1_ref[...])

    # layer 2: Linear(hidden, hidden) + tanh
    h = jnp.tanh(
        jnp.dot(h.astype(cdt), w2_ref[...], preferred_element_type=jnp.float32)
        + b2_ref[...])

    # output layer: Linear(hidden, 2*latent_dim), no activation
    z = (jnp.dot(h.astype(cdt), w3_ref[...], preferred_element_type=jnp.float32)
         + b3_ref[...])

    z_ref[...] = z.astype(z_ref.dtype)


def prepare_params(params, latent_dim, *, compute_dtype=jnp.float32, lane=128):
    """One-time layout prep: transpose to (in, out); zero-pad hidden to 128.

    params: PyTorch-convention weights
        w1 (hidden, n), b1 (hidden,)
        w2 (hidden, hidden), b2 (hidden,)
        w3 (2*latent_dim, hidden), b3 (2*latent_dim,)
    Zero padding of the hidden dim is numerically exact (tanh(0)=0, zero
    rows/cols contribute nothing). The input dim n and the output dim
    2*latent_dim are left unpadded (full-extent blocks).
    """
    hidden, n = params["w1"].shape
    out_dim = params["w3"].shape[0]
    assert out_dim == 2 * latent_dim
    hp = _round_up(hidden, lane)

    def pad2(a, rows, cols):
        return jnp.pad(a, ((0, rows - a.shape[0]), (0, cols - a.shape[1])))

    w1 = pad2(params["w1"].T, n, hp).astype(compute_dtype)          # (n, hp)
    b1 = pad2(params["b1"].reshape(1, hidden), 1, hp).astype(jnp.float32)
    w2 = pad2(params["w2"].T, hp, hp).astype(compute_dtype)         # (hp, hp)
    b2 = pad2(params["b2"].reshape(1, hidden), 1, hp).astype(jnp.float32)
    w3 = pad2(params["w3"].T, hp, out_dim).astype(compute_dtype)    # (hp, od)
    b3 = params["b3"].reshape(1, out_dim).astype(jnp.float32)       # (1, od)

    return dict(w1=w1, b1=b1, w2=w2, b2=b2, w3=w3, b3=b3,
                n=n, hidden=hidden, hidden_pad=hp, out_dim=out_dim,
                latent_dim=latent_dim, compute_dtype=compute_dtype)


def _choose_batch_tile(B, max_tile=512):
    """Rows per grid step: multiple of 8, capped, grid >= 2 and even if possible.

    max_tile=512 reaches ~85% of HBM roofline while keeping f32 double-buffers
    well inside v5e's 16 MiB default scoped-VMEM limit. An even grid length
    balances v7x's two TensorCores under dimension_semantics=("parallel",).
    """
    if B <= 8:
        return 8
    tile = min(max_tile, _round_up(_cdiv(B, 2), 8))   # start from a 2-way split
    g = _cdiv(B, tile)
    if g > 1 and g % 2 == 1:
        tile = max(8, _round_up(_cdiv(B, g + 1), 8))  # nudge to an even grid
    return tile


def inference_network_forward(x, prepped, *, batch_tile=None):
    """Runs the InferenceNetwork forward pass with a single Pallas kernel.

    x: (B, n) in its native dtype (no wrapper cast/pad).
    prepped: output of prepare_params().
    Returns (z_mu, z_logstd), each (B, latent_dim) in float32.
    """
    B, n = x.shape
    assert n == prepped["n"]
    hp = prepped["hidden_pad"]
    out_dim = prepped["out_dim"]
    ld = prepped["latent_dim"]
    hidden = prepped["hidden"]

    if batch_tile is None:
        batch_tile = _choose_batch_tile(B)
    batch_tile = min(batch_tile, _round_up(B, 8))
    assert batch_tile % 8 == 0, "batch_tile must be a multiple of 8 (sublane)"
    # Ragged tail: reads past B hit garbage rows (rows are independent) and
    # writes past B are masked out by Pallas, so no padding pass over x.
    grid = (_cdiv(B, batch_tile),)

    weights = (prepped["w1"], prepped["b1"], prepped["w2"], prepped["b2"],
               prepped["w3"], prepped["b3"])
    weight_bytes = sum(int(w.size) * w.dtype.itemsize for w in weights)
    cost = pl.CostEstimate(
        flops=2 * B * (n * hidden + hidden * hidden + hidden * out_dim),
        transcendentals=2 * B * hidden,
        bytes_accessed=(int(x.size) * x.dtype.itemsize
                        + weight_bytes + B * out_dim * 4),
    )

    def make_call(weight_pipeline_mode):
        wkw = ({} if weight_pipeline_mode is None
               else {"pipeline_mode": weight_pipeline_mode})
        const = lambda i: (0, 0)
        return pl.pallas_call(
            _mlp_kernel,
            out_shape=jax.ShapeDtypeStruct((B, out_dim), jnp.float32),
            grid_spec=pltpu.PrefetchScalarGridSpec(
                num_scalar_prefetch=0,
                grid=grid,
                in_specs=[
                    pl.BlockSpec((batch_tile, n), lambda i: (i, 0)),   # x tile
                    pl.BlockSpec((n, hp), const, **wkw),               # w1
                    pl.BlockSpec((1, hp), const, **wkw),               # b1
                    pl.BlockSpec((hp, hp), const, **wkw),              # w2
                    pl.BlockSpec((1, hp), const, **wkw),               # b2
                    pl.BlockSpec((hp, out_dim), const, **wkw),         # w3
                    pl.BlockSpec((1, out_dim), const, **wkw),          # b3
                ],
                out_specs=pl.BlockSpec((batch_tile, out_dim), lambda i: (i, 0)),
            ),
            compiler_params=pltpu.CompilerParams(
                dimension_semantics=("parallel",)),
            cost_estimate=cost,
        )

    try:
        # Weights/biases have constant block indices: a single VMEM buffer is
        # enough (the second pipeline buffer is dead weight).
        z = make_call(pl.Buffered(1))(x, *weights)
    except Exception:
        # Fallback if this Pallas version rejects buffer_count=1.
        z = make_call(None)(x, *weights)

    # Tiny (B, 2*latent_dim) slab; these slices are negligible.
    z_mu = z[:, :ld]
    z_logstd = z[:, ld:]
    return z_mu, z_logstd


def init_params(key, n, hidden_dim, latent_dim):
    """Deterministic PyTorch-style init: U(-1/sqrt(fan_in), 1/sqrt(fan_in))."""
    ks = jax.random.split(key, 6)

    def lin(kw, kb, n_out, n_in):
        bound = 1.0 / jnp.sqrt(jnp.float32(n_in))
        w = jax.random.uniform(kw, (n_out, n_in), jnp.float32, -bound, bound)
        b = jax.random.uniform(kb, (n_out,), jnp.float32, -bound, bound)
        return w, b

    w1, b1 = lin(ks[0], ks[1], hidden_dim, n)
    w2, b2 = lin(ks[2], ks[3], hidden_dim, hidden_dim)
    w3, b3 = lin(ks[4], ks[5], 2 * latent_dim, hidden_dim)
    return {"w1": w1, "b1": b1, "w2": w2, "b2": b2, "w3": w3, "b3": b3}


def reference_forward(x, params, latent_dim):
    """Pure-JAX reference matching PyTorch semantics."""
    h = jnp.tanh(x @ params["w1"].T + params["b1"])
    h = jnp.tanh(h @ params["w2"].T + params["b2"])
    z = h @ params["w3"].T + params["b3"]
    return z[:, :latent_dim], z[:, latent_dim:]


if __name__ == "__main__":
    # Flattened 16x16 image -> n=256, hidden_dim=32, latent_dim=4,
    # num_layers=2 (tanh activations, resid=False).
    B, n, hidden_dim, latent_dim = 8, 16 * 16, 32, 4

    key = jax.random.PRNGKey(0)
    kx, kp, kx2 = jax.random.split(key, 3)
    x = jax.random.normal(kx, (B, n), jnp.float32)
    params = init_params(kp, n, hidden_dim, latent_dim)
    ref_mu, ref_logstd = reference_forward(x, params, latent_dim)

    # f32 compute path (bit-accurate vs reference).
    prepped_f32 = prepare_params(params, latent_dim, compute_dtype=jnp.float32)
    z_mu, z_logstd = inference_network_forward(x, prepped_f32)
    jax.block_until_ready((z_mu, z_logstd))
    assert z_mu.shape == (B, latent_dim) and z_logstd.shape == (B, latent_dim)
    assert jnp.allclose(z_mu, ref_mu, atol=1e-5, rtol=1e-5)
    assert jnp.allclose(z_logstd, ref_logstd, atol=1e-5, rtol=1e-5)

    # bf16 compute path (MXU-friendly on v6e/v7x); loose tolerance.
    prepped_bf16 = prepare_params(params, latent_dim, compute_dtype=jnp.bfloat16)
    z_mu_bf, z_logstd_bf = inference_network_forward(x, prepped_bf16)
    jax.block_until_ready((z_mu_bf, z_logstd_bf))
    assert jnp.allclose(z_mu_bf, ref_mu, atol=5e-2, rtol=5e-2)
    assert jnp.allclose(z_logstd_bf, ref_logstd, atol=5e-2, rtol=5e-2)

    # Ragged batch (B not a multiple of the tile): exercises the cdiv grid
    # with a masked tail block.
    B2 = 20
    x2 = jax.random.normal(kx2, (B2, n), jnp.float32)
    ref_mu2, ref_logstd2 = reference_forward(x2, params, latent_dim)
    z_mu2, z_logstd2 = inference_network_forward(x2, prepped_f32)
    jax.block_until_ready((z_mu2, z_logstd2))
    assert z_mu2.shape == (B2, latent_dim)
    assert jnp.allclose(z_mu2, ref_mu2, atol=1e-5, rtol=1e-5)
    assert jnp.allclose(z_logstd2, ref_logstd2, atol=1e-5, rtol=1e-5)

    print("KERNEL_OK")
</pallas_src>

<mosaic_0001>
module attributes {stable_mosaic.version = 11 : i64} {
  func.func @_mlp_kernel(%arg0: i32, %arg1: memref<8x256xf32, #tpu.memory_space<vmem>>, %arg2: memref<256x128xf32, #tpu.memory_space<vmem>>, %arg3: memref<1x128xf32, #tpu.memory_space<vmem>>, %arg4: memref<128x128xf32, #tpu.memory_space<vmem>>, %arg5: memref<1x128xf32, #tpu.memory_space<vmem>>, %arg6: memref<128x8xf32, #tpu.memory_space<vmem>>, %arg7: memref<1x8xf32, #tpu.memory_space<vmem>>, %arg8: memref<8x8xf32, #tpu.memory_space<vmem>>) attributes {dimension_semantics = [#tpu.dimension_semantics<parallel>], iteration_bounds = array<i64: 1>, scalar_prefetch = 0 : i64, scratch_operands = 0 : i64, tpu.core_type = #tpu.core_type<tc>, window_params = [{transform_indices = @transform_0, window_bounds = array<i64: 8, 256>}, {pipeline_mode = #tpu.pipeline_mode<synchronous>, transform_indices = @transform_1, window_bounds = array<i64: 256, 128>}, {pipeline_mode = #tpu.pipeline_mode<synchronous>, transform_indices = @transform_2, window_bounds = array<i64: 1, 128>}, {pipeline_mode = #tpu.pipeline_mode<synchronous>, transform_indices = @transform_3, window_bounds = array<i64: 128, 128>}, {pipeline_mode = #tpu.pipeline_mode<synchronous>, transform_indices = @transform_4, window_bounds = array<i64: 1, 128>}, {pipeline_mode = #tpu.pipeline_mode<synchronous>, transform_indices = @transform_5, window_bounds = array<i64: 128, 8>}, {pipeline_mode = #tpu.pipeline_mode<synchronous>, transform_indices = @transform_6, window_bounds = array<i64: 1, 8>}, {transform_indices = @transform_7, window_bounds = array<i64: 8, 8>}]} {
    %c0 = arith.constant 0 : index
    %c0_0 = arith.constant 0 : index
    %0 = vector.load %arg1[%c0, %c0_0] : memref<8x256xf32, #tpu.memory_space<vmem>>, vector<8x256xf32>
    %c0_1 = arith.constant 0 : index
    %c0_2 = arith.constant 0 : index
    %1 = vector.load %arg2[%c0_1, %c0_2] : memref<256x128xf32, #tpu.memory_space<vmem>>, vector<256x128xf32>
    %cst = arith.constant dense<0.000000e+00> : vector<8x128xf32>
    %2 = tpu.matmul %0, %1, %cst {dimension_numbers = #tpu.dot_dimension_numbers<[1], [0], [0], [1], [0, 0, 1, 1], [], []>} : vector<8x256xf32>, vector<256x128xf32>, vector<8x128xf32> -> vector<8x128xf32>
    %c0_3 = arith.constant 0 : index
    %c0_4 = arith.constant 0 : index
    %3 = vector.load %arg3[%c0_3, %c0_4] : memref<1x128xf32, #tpu.memory_space<vmem>>, vector<1x128xf32>
    %4 = vector.broadcast %3 : vector<1x128xf32> to vector<8x128xf32>
    %5 = arith.addf %2, %4 : vector<8x128xf32>
    %6 = math.tanh %5 : vector<8x128xf32>
    %c0_5 = arith.constant 0 : index
    %c0_6 = arith.constant 0 : index
    %7 = vector.load %arg4[%c0_5, %c0_6] : memref<128x128xf32, #tpu.memory_space<vmem>>, vector<128x128xf32>
    %cst_7 = arith.constant dense<0.000000e+00> : vector<8x128xf32>
    %8 = tpu.matmul %6, %7, %cst_7 {dimension_numbers = #tpu.dot_dimension_numbers<[1], [0], [0], [1], [0, 0, 1, 1], [], []>} : vector<8x128xf32>, vector<128x128xf32>, vector<8x128xf32> -> vector<8x128xf32>
    %c0_8 = arith.constant 0 : index
    %c0_9 = arith.constant 0 : index
    %9 = vector.load %arg5[%c0_8, %c0_9] : memref<1x128xf32, #tpu.memory_space<vmem>>, vector<1x128xf32>
    %10 = vector.broadcast %9 : vector<1x128xf32> to vector<8x128xf32>
    %11 = arith.addf %8, %10 : vector<8x128xf32>
    %12 = math.tanh %11 : vector<8x128xf32>
    %c0_10 = arith.constant 0 : index
    %c0_11 = arith.constant 0 : index
    %13 = vector.load %arg6[%c0_10, %c0_11] : memref<128x8xf32, #tpu.memory_space<vmem>>, vector<128x8xf32>
    %cst_12 = arith.constant dense<0.000000e+00> : vector<8x8xf32>
    %14 = tpu.matmul %12, %13, %cst_12 {dimension_numbers = #tpu.dot_dimension_numbers<[1], [0], [0], [1], [0, 0, 1, 1], [], []>} : vector<8x128xf32>, vector<128x8xf32>, vector<8x8xf32> -> vector<8x8xf32>
    %c0_13 = arith.constant 0 : index
    %c0_14 = arith.constant 0 : index
    %15 = vector.load %arg7[%c0_13, %c0_14] : memref<1x8xf32, #tpu.memory_space<vmem>>, vector<1x8xf32>
    %16 = vector.broadcast %15 : vector<1x8xf32> to vector<8x8xf32>
    %17 = arith.addf %14, %16 : vector<8x8xf32>
    %c0_15 = arith.constant 0 : index
    %c0_16 = arith.constant 0 : index
    %18 = vector.load %arg8[%c0_15, %c0_16] : memref<8x8xf32, #tpu.memory_space<vmem>>, vector<8x8xf32>
    tpu.vector_store %arg8[%c0_15, %c0_16], %17 {strides = array<i32>} : memref<8x8xf32, #tpu.memory_space<vmem>>, vector<8x8xf32>,
    return
  }
  func.func @transform_0(%arg0: i32) -> (i32, i32) {
    %c0_i32 = arith.constant 0 : i32
    %c0_i32_0 = arith.constant 0 : i32
    return %arg0, %c0_i32 : i32, i32
  }
  func.func @transform_1(%arg0: i32) -> (i32, i32) {
    %c0_i32 = arith.constant 0 : i32
    %c0_i32_0 = arith.constant 0 : i32
    %c0_i32_1 = arith.constant 0 : i32
    return %c0_i32, %c0_i32_0 : i32, i32
  }
  func.func @transform_2(%arg0: i32) -> (i32, i32) {
    %c0_i32 = arith.constant 0 : i32
    %c0_i32_0 = arith.constant 0 : i32
    %c0_i32_1 = arith.constant 0 : i32
    return %c0_i32, %c0_i32_0 : i32, i32
  }
  func.func @transform_3(%arg0: i32) -> (i32, i32) {
    %c0_i32 = arith.constant 0 : i32
    %c0_i32_0 = arith.constant 0 : i32
    %c0_i32_1 = arith.constant 0 : i32
    return %c0_i32, %c0_i32_0 : i32, i32
  }
  func.func @transform_4(%arg0: i32) -> (i32, i32) {
    %c0_i32 = arith.constant 0 : i32
    %c0_i32_0 = arith.constant 0 : i32
    %c0_i32_1 = arith.constant 0 : i32
    return %c0_i32, %c0_i32_0 : i32, i32
  }
  func.func @transform_5(%arg0: i32) -> (i32, i32) {
    %c0_i32 = arith.constant 0 : i32
    %c0_i32_0 = arith.constant 0 : i32
    %c0_i32_1 = arith.constant 0 : i32
    return %c0_i32, %c0_i32_0 : i32, i32
  }
  func.func @transform_6(%arg0: i32) -> (i32, i32) {
    %c0_i32 = arith.constant 0 : i32
    %c0_i32_0 = arith.constant 0 : i32
    %c0_i32_1 = arith.constant 0 : i32
    return %c0_i32, %c0_i32_0 : i32, i32
  }
  func.func @transform_7(%arg0: i32) -> (i32, i32) {
    %c0_i32 = arith.constant 0 : i32
    %c0_i32_0 = arith.constant 0 : i32
    return %arg0, %c0_i32 : i32, i32
  }
}

module attributes {stable_mosaic.version = 11 : i64} {
  func.func @_mlp_kernel(%arg0: i32, %arg1: memref<8x256xf32, #tpu.memory_space<vmem>>, %arg2: memref<256x128xf32, #tpu.memory_space<vmem>>, %arg3: memref<1x128xf32, #tpu.memory_space<vmem>>, %arg4: memref<128x128xf32, #tpu.memory_space<vmem>>, %arg5: memref<1x128xf32, #tpu.memory_space<vmem>>, %arg6: memref<128x8xf32, #tpu.memory_space<vmem>>, %arg7: memref<1x8xf32, #tpu.memory_space<vmem>>, %arg8: memref<8x8xf32, #tpu.memory_space<vmem>>) attributes {dimension_semantics = [#tpu.dimension_semantics<parallel>], iteration_bounds = array<i64: 1>, scalar_prefetch = 0 : i64, scratch_operands = 0 : i64, tpu.core_type = #tpu.core_type<tc>, window_params = [{transform_indices = @transform_0, window_bounds = array<i64: 8, 256>}, {pipeline_mode = #tpu.pipeline_mode<synchronous>, transform_indices = @transform_1, window_bounds = array<i64: 256, 128>}, {pipeline_mode = #tpu.pipeline_mode<synchronous>, transform_indices = @transform_2, window_bounds = array<i64: 1, 128>}, {pipeline_mode = #tpu.pipeline_mode<synchronous>, transform_indices = @transform_3, window_bounds = array<i64: 128, 128>}, {pipeline_mode = #tpu.pipeline_mode<synchronous>, transform_indices = @transform_4, window_bounds = array<i64: 1, 128>}, {pipeline_mode = #tpu.pipeline_mode<synchronous>, transform_indices = @transform_5, window_bounds = array<i64: 128, 8>}, {pipeline_mode = #tpu.pipeline_mode<synchronous>, transform_indices = @transform_6, window_bounds = array<i64: 1, 8>}, {transform_indices = @transform_7, window_bounds = array<i64: 8, 8>}]} {
    %c0 = arith.constant 0 : index
    %c0_0 = arith.constant 0 : index
    %0 = vector.load %arg1[%c0, %c0_0] : memref<8x256xf32, #tpu.memory_space<vmem>>, vector<8x256xf32>
    %c0_1 = arith.constant 0 : index
    %c0_2 = arith.constant 0 : index
    %1 = vector.load %arg2[%c0_1, %c0_2] : memref<256x128xf32, #tpu.memory_space<vmem>>, vector<256x128xf32>
    %cst = arith.constant dense<0.000000e+00> : vector<8x128xf32>
    %2 = tpu.matmul %0, %1, %cst {dimension_numbers = #tpu.dot_dimension_numbers<[1], [0], [0], [1], [0, 0, 1, 1], [], []>} : vector<8x256xf32>, vector<256x128xf32>, vector<8x128xf32> -> vector<8x128xf32>
    %c0_3 = arith.constant 0 : index
    %c0_4 = arith.constant 0 : index
    %3 = vector.load %arg3[%c0_3, %c0_4] : memref<1x128xf32, #tpu.memory_space<vmem>>, vector<1x128xf32>
    %4 = vector.broadcast %3 : vector<1x128xf32> to vector<8x128xf32>
    %5 = arith.addf %2, %4 : vector<8x128xf32>
    %6 = math.tanh %5 : vector<8x128xf32>
    %c0_5 = arith.constant 0 : index
    %c0_6 = arith.constant 0 : index
    %7 = vector.load %arg4[%c0_5, %c0_6] : memref<128x128xf32, #tpu.memory_space<vmem>>, vector<128x128xf32>
    %cst_7 = arith.constant dense<0.000000e+00> : vector<8x128xf32>
    %8 = tpu.matmul %6, %7, %cst_7 {dimension_numbers = #tpu.dot_dimension_numbers<[1], [0], [0], [1], [0, 0, 1, 1], [], []>} : vector<8x128xf32>, vector<128x128xf32>, vector<8x128xf32> -> vector<8x128xf32>
    %c0_8 = arith.constant 0 : index
    %c0_9 = arith.constant 0 : index
    %9 = vector.load %arg5[%c0_8, %c0_9] : memref<1x128xf32, #tpu.memory_space<vmem>>, vector<1x128xf32>
    %10 = vector.broadcast %9 : vector<1x128xf32> to vector<8x128xf32>
    %11 = arith.addf %8, %10 : vector<8x128xf32>
    %12 = math.tanh %11 : vector<8x128xf32>
    %c0_10 = arith.constant 0 : index
    %c0_11 = arith.constant 0 : index
    %13 = vector.load %arg6[%c0_10, %c0_11] : memref<128x8xf32, #tpu.memory_space<vmem>>, vector<128x8xf32>
    %cst_12 = arith.constant dense<0.000000e+00> : vector<8x8xf32>
    %14 = tpu.matmul %12, %13, %cst_12 {dimension_numbers = #tpu.dot_dimension_numbers<[1], [0], [0], [1], [0, 0, 1, 1], [], []>} : vector<8x128xf32>, vector<128x8xf32>, vector<8x8xf32> -> vector<8x8xf32>
    %c0_13 = arith.constant 0 : index
    %c0_14 = arith.constant 0 : index
    %15 = vector.load %arg7[%c0_13, %c0_14] : memref<1x8xf32, #tpu.memory_space<vmem>>, vector<1x8xf32>
    %16 = vector.broadcast %15 : vector<1x8xf32> to vector<8x8xf32>
    %17 = arith.addf %14, %16 : vector<8x8xf32>
    %c0_15 = arith.constant 0 : index
    %c0_16 = arith.constant 0 : index
    %18 = vector.load %arg8[%c0_15, %c0_16] : memref<8x8xf32, #tpu.memory_space<vmem>>, vector<8x8xf32>
    tpu.vector_store %arg8[%c0_15, %c0_16], %17 {strides = array<i32>} : memref<8x8xf32, #tpu.memory_space<vmem>>, vector<8x8xf32>,
    return
  }
  func.func @transform_0(%arg0: i32) -> (i32, i32) {
    %c0_i32 = arith.constant 0 : i32
    %c0_i32_0 = arith.constant 0 : i32
    return %arg0, %c0_i32 : i32, i32
  }
  func.func @transform_1(%arg0: i32) -> (i32, i32) {
    %c0_i32 = arith.constant 0 : i32
    %c0_i32_0 = arith.constant 0 : i32
    %c0_i32_1 = arith.constant 0 : i32
    return %c0_i32, %c0_i32_0 : i32, i32
  }
  func.func @transform_2(%arg0: i32) -> (i32, i32) {
    %c0_i32 = arith.constant 0 : i32
    %c0_i32_0 = arith.constant 0 : i32
    %c0_i32_1 = arith.constant 0 : i32
    return %c0_i32, %c0_i32_0 : i32, i32
  }
  func.func @transform_3(%arg0: i32) -> (i32, i32) {
    %c0_i32 = arith.constant 0 : i32
    %c0_i32_0 = arith.constant 0 : i32
    %c0_i32_1 = arith.constant 0 : i32
    return %c0_i32, %c0_i32_0 : i32, i32
  }
  func.func @transform_4(%arg0: i32) -> (i32, i32) {
    %c0_i32 = arith.constant 0 : i32
    %c0_i32_0 = arith.constant 0 : i32
    %c0_i32_1 = arith.constant 0 : i32
    return %c0_i32, %c0_i32_0 : i32, i32
  }
  func.func @transform_5(%arg0: i32) -> (i32, i32) {
    %c0_i32 = arith.constant 0 : i32
    %c0_i32_0 = arith.constant 0 : i32
    %c0_i32_1 = arith.constant 0 : i32
    return %c0_i32, %c0_i32_0 : i32, i32
  }
  func.func @transform_6(%arg0: i32) -> (i32, i32) {
    %c0_i32 = arith.constant 0 : i32
    %c0_i32_0 = arith.constant 0 : i32
    %c0_i32_1 = arith.constant 0 : i32
    return %c0_i32, %c0_i32_0 : i32, i32
  }
  func.func @transform_7(%arg0: i32) -> (i32, i32) {
    %c0_i32 = arith.constant 0 : i32
    %c0_i32_0 = arith.constant 0 : i32
    return %arg0, %c0_i32 : i32, i32
  }
}

</mosaic_0001>

<bundles_post_ra>
// kernel: tpu_custom_call.1
= control target key start
LH: loop header
LB: loop body
LE: loop exit
PB: predicated region body
PF: predicated region fallthrough
CT: control target
= control target key end

     0   :  { %12 = vsyncpa [#allocation3], 0  ;;  %s836_s0 = inlined_call_operand.vmem [shape: f32[8,256], index: 0, kind: input, shape index: {}]   ;;  %s837_s1 = inlined_call_operand.hbm [shape: f32[256,128], index: 1, kind: input, shape index: {}]   ;;  %s838_s2 = inlined_call_operand.vmem [shape: f32[1,128], index: 2, kind: input, shape index: {}]   ;;  %s839_s3 = inlined_call_operand.vmem [shape: f32[128,128], index: 3, kind: input, shape index: {}]   ;;  %s840_s4 = inlined_call_operand.vmem [shape: f32[1,128], index: 4, kind: input, shape index: {}]   ;;  %s841_s5 = inlined_call_operand.vmem [shape: f32[128,8], index: 5, kind: input, shape index: {}]   ;;  %s842_s6 = inlined_call_operand.vmem [shape: f32[1,8], index: 6, kind: input, shape index: {}]   ;;  %s843_s7 = inlined_call_operand.hbm [shape: f32[8,8], index: 7, kind: output, shape index: {}]  }
   0x1   :  { %13 = vsyncpa [#allocation4], 0  ;;  %s638_s24 = smov [#allocation2]   ;;  %s590_s28 = scalar_lea.hbm %s837_s1, 4096 }
   0x2   :  { %s21_s25 = sshll.u32 %s638_s24, 4  ;;  %p591_p0 = scmp.ne.s32.totalorder %s837_s1, %s590_s28  ;;  %s22_s25 = int_to_ptr.vmem [resolvable:$true] %s21_s25 }
   0x3   :  { %p594_p1 = scmp.lt.u32.totalorder %s590_s28, %s837_s1 }
   0x5   :  { %p596_p2 = pnand %p594_p1, %p591_p0 }
   0x7   :  { %599 = shalt.err (!%p596_p2)
}
   0x8   :  { %s600_s10 = scalar_lea.vmem %s22_s25, 4096  ;;  %p605_p4 = scmp.lt.s32.totalorder %s22_s25, %s22_s25 }
   0x9   :  { %p601_p3 = scmp.ne.s32.totalorder %s22_s25, %s600_s10  ;;  %p606_p5 = scmp.lt.s32.totalorder %s600_s10, %s600_s10 }
   0xb   :  { %p607_p6 = por %p606_p5, %p605_p4 }
   0xd   :  { %p608_p7 = pnand %p607_p6, %p601_p3 }
   0xf   :  { %611 = shalt.err (!%p608_p7)
}
  0x10   :  { %s639_s11 = smov 128   ;;  %s640_s12 = smov 8  }
  0x11   :  { %27 = dma.hbm_to_vmem [thread:$0]  %s837_s1, 4096, %s22_s25, [#allocation3], %s639_s11, %s639_s11, %s640_s12  }
  0x12   :  { %634 = dma.done.wait [#allocation3], 4096  }
  0x13   :  { %635 = vsyncadd [#allocation3], 4294963200  ;;  %v641_v0 = vmov 0.0|0.0   ;;  %v59_v1 = vld [vmem:[#allocation2 + $0x80] sm:$0xff]  ;;  %v60_v2 = vld [vmem:[#allocation2 + $0x88] sm:$0xff]  ;;  %vm642_vm0 = vmmov 0  }
  0x14   :  { %531 = vmatprep.subr.bf16.mxu1 %v641_v0  ;;  %v43_v3 = vld [vmem:[#allocation2] sm:$0xff]  ;;  %v499_v4 = vpack.c.bf16 %v60_v2, %v59_v1  ;;  %v44_v5 = vld [vmem:[#allocation2 + $0x8] sm:$0xff]  ;;  %v61_v6 = vld [vmem:[#allocation2 + $0x90] sm:$0xff]  ;;  %vm340_vm1 = vcmask 64512  }
  0x15   :  { %v62_v7 = vld [vmem:[#allocation2 + $0x98] sm:$0xff]  ;;  %v501_v8 = vpack.c.bf16 %v44_v5, %v43_v3  ;;  %v45_v10 = vld [vmem:[#allocation2 + $0x10] sm:$0xff]  ;;  %v63_v12 = vld [vmem:[#allocation2 + $0xa0] sm:$0xff] }
  0x16   :  { %v503_v9 = vpack.c.bf16 %v62_v7, %v61_v6  ;;  %v46_v11 = vld [vmem:[#allocation2 + $0x18] sm:$0xff]  ;;  %500 = vmatprep.subr.bf16.mxu0 %v499_v4  ;;  %v64_v13 = vld [vmem:[#allocation2 + $0xa8] sm:$0xff]  ;;  %v47_v16 = vld [vmem:[#allocation2 + $0x20] sm:$0xff] }
  0x17   :  { %502 = vmatpush3.bf16.msra.mxu0 %v501_v8  ;;  %v505_v14 = vpack.c.bf16 %v46_v11, %v45_v10  ;;  %v507_v15 = vpack.c.bf16 %v64_v13, %v63_v12  ;;  %v48_v17 = vld [vmem:[#allocation2 + $0x28] sm:$0xff]  ;;  %v65_v18 = vld [vmem:[#allocation2 + $0xb0] sm:$0xff]  ;;  %v66_v19 = vld [vmem:[#allocation2 + $0xb8] sm:$0xff]  ;;  %v643_v11 = vmov 0.0  }
  0x18   :  { %504 = vmatprep.subr.bf16.mxu0 %v503_v9  ;;  %v509_v20 = vpack.c.bf16 %v48_v17, %v47_v16  ;;  %v511_v21 = vpack.c.bf16 %v66_v19, %v65_v18  ;;  %v49_v22 = vld [vmem:[#allocation2 + $0x30] sm:$0xff]  ;;  %v50_v23 = vld [vmem:[#allocation2 + $0x38] sm:$0xff]  ;;  %v67_v24 = vld [vmem:[#allocation2 + $0xc0] sm:$0xff]  ;;  %461 = vmatprep.mubr.msk.f32.mxu1 %vm642_vm0, %v643_v11 }
  0x19   :  { %v68_v25 = vld [vmem:[#allocation2 + $0xc8] sm:$0xff]  ;;  %v153_v27 = vld [vmem:[%s839_s3] sm:$0xff]  ;;  %v513_v29 = vpack.c.bf16 %v50_v23, %v49_v22  ;;  %v155_v31 = vld [vmem:[%s839_s3 + $0x10] sm:$0xff] }
  0x1a   :  { %v42_v26 = vld [vmem:[%s836_s0 + $0x8] sm:$0xff]  ;;  %v156_v32 = vld [vmem:[%s839_s3 + $0x18] sm:$0xff]  ;;  %v515_v33 = vpack.c.bf16 %v68_v25, %v67_v24  ;;  %v51_v34 = vld [vmem:[#allocation2 + $0x40] sm:$0xff] }
  0x1b   :  { %506 = vmatpush3.bf16.msra.mxu0 %v505_v14  ;;  %146 = vmatprep.mubr.f32.mxu0 %v42_v26  ;;  %v154_v28 = vld [vmem:[%s839_s3 + $0x8] sm:$0xff]  ;;  %v69_v36 = vld [vmem:[#allocation2 + $0xd0] sm:$0xff]  ;;  %v70_v37 = vld [vmem:[#allocation2 + $0xd8] sm:$0xff]  ;;  %v535_v38 = vpack.c.bf16 %v156_v32, %v155_v31 }
  0x1c   :  { %508 = vmatprep.subr.bf16.mxu0 %v507_v15  ;;  %v532_v30 = vpack.c.bf16 %v154_v28, %v153_v27  ;;  %v52_v35 = vld [vmem:[#allocation2 + $0x48] sm:$0xff]  ;;  %v157_v39 = vld [vmem:[%s839_s3 + $0x20] sm:$0xff]  ;;  %v519_v42 = vpack.c.bf16 %v70_v37, %v69_v36  ;;  %v53_v43 = vld [vmem:[#allocation2 + $0x50] sm:$0xff] }
  0x1d   :  { %v158_v40 = vld [vmem:[%s839_s3 + $0x28] sm:$0xff]  ;;  %v517_v41 = vpack.c.bf16 %v52_v35, %v51_v34  ;;  %v54_v44 = vld [vmem:[#allocation2 + $0x58] sm:$0xff]  ;;  %v71_v45 = vld [vmem:[#allocation2 + $0xe0] sm:$0xff] }
  0x1e   :  { %533 = vmatpush3.bf16.msra.mxu1 %v532_v30  ;;  %v72_v46 = vld [vmem:[#allocation2 + $0xe8] sm:$0xff]  ;;  %v538_v47 = vpack.c.bf16 %v158_v40, %v157_v39  ;;  %v159_v48 = vld [vmem:[%s839_s3 + $0x30] sm:$0xff]  ;;  %v160_v49 = vld [vmem:[%s839_s3 + $0x38] sm:$0xff]  ;;  %v521_v50 = vpack.c.bf16 %v54_v44, %v53_v43 }
  0x1f   :  { %510 = vmatpush3.bf16.msra.mxu0 %v509_v20  ;;  %534 = vmatprep.subr.bf16.mxu1 %v641_v0  ;;  %v523_v51 = vpack.c.bf16 %v72_v46, %v71_v45  ;;  %v55_v52 = vld [vmem:[#allocation2 + $0x60] sm:$0xff]  ;;  %v56_v53 = vld [vmem:[#allocation2 + $0x68] sm:$0xff]  ;;  %v73_v54 = vld [vmem:[#allocation2 + $0xf0] sm:$0xff]  ;;  %v541_v56 = vpack.c.bf16 %v160_v49, %v159_v48 }
  0x20   :  { %512 = vmatprep.subr.bf16.mxu0 %v511_v21  ;;  %v74_v55 = vld [vmem:[#allocation2 + $0xf8] sm:$0xff]  ;;  %v525_v57 = vpack.c.bf16 %v56_v53, %v55_v52  ;;  %v57_v59 = vld [vmem:[#allocation2 + $0x70] sm:$0xff]  ;;  %v41_v62 = vld [vmem:[%s836_s0] sm:$0xff] }
  0x21   :  { %v527_v58 = vpack.c.bf16 %v74_v55, %v73_v54  ;;  %v58_v60 = vld [vmem:[#allocation2 + $0x78] sm:$0xff]  ;;  %v161_v63 = vld [vmem:[%s839_s3 + $0x40] sm:$0xff]  ;;  %v162_v1 = vld [vmem:[%s839_s3 + $0x48] sm:$0xff] }
  0x22   :  { %536 = vmatpush3.bf16.msra.mxu1 %v535_v38  ;;  %v529_v61 = vpack.c.bf16 %v58_v60, %v57_v59  ;;  %v544_v2 = vpack.c.bf16 %v162_v1, %v161_v63  ;;  %v163_v3 = vld [vmem:[%s839_s3 + $0x50] sm:$0xff]  ;;  %v164_v4 = vld [vmem:[%s839_s3 + $0x58] sm:$0xff]  ;;  %v165_v6 = vld [vmem:[%s839_s3 + $0x60] sm:$0xff] }
  0x23   :  { %514 = vmatpush3.bf16.msra.mxu0 %v513_v29  ;;  %537 = vmatprep.subr.bf16.mxu1 %v641_v0  ;;  %v547_v5 = vpack.c.bf16 %v164_v4, %v163_v3  ;;  %v166_v7 = vld [vmem:[%s839_s3 + $0x68] sm:$0xff]  ;;  %v167_v9 = vld [vmem:[%s839_s3 + $0x70] sm:$0xff]  ;;  %v168_v10 = vld [vmem:[%s839_s3 + $0x78] sm:$0xff] }
  0x24   :  { %516 = vmatprep.subr.bf16.mxu0 %v515_v33  ;;  %v550_v8 = vpack.c.bf16 %v166_v7, %v165_v6  ;;  %v553_v12 = vpack.c.bf16 %v168_v10, %v167_v9  ;;  %v247_v13 = vld [vmem:[%s841_s5] sm:$0xff]  ;;  %v248_v14 = vld [vmem:[%s841_s5 + $0x8] sm:$0xff]  ;;  %v249_v15 = vld [vmem:[%s841_s5 + $0x10] sm:$0xff] }
  0x25   :  { %v556_v16 = vpack.c.bf16 %v248_v14, %v247_v13  ;;  %v250_v17 = vld [vmem:[%s841_s5 + $0x18] sm:$0xff]  ;;  %v251_v19 = vld [vmem:[%s841_s5 + $0x20] sm:$0xff]  ;;  %v252_v20 = vld [vmem:[%s841_s5 + $0x28] sm:$0xff] }
  0x26   :  { %539 = vmatpush3.bf16.msra.mxu1 %v538_v47  ;;  %v559_v18 = vpack.c.bf16 %v250_v17, %v249_v15  ;;  %v562_v21 = vpack.c.bf16 %v252_v20, %v251_v19  ;;  %v253_v22 = vld [vmem:[%s841_s5 + $0x30] sm:$0xff]  ;;  %v254_v23 = vld [vmem:[%s841_s5 + $0x38] sm:$0xff]  ;;  %v255_v25 = vld [vmem:[%s841_s5 + $0x40] sm:$0xff] }
  0x27   :  { %518 = vmatpush3.bf16.msra.mxu0 %v517_v41  ;;  %540 = vmatprep.subr.bf16.mxu1 %v641_v0  ;;  %v565_v24 = vpack.c.bf16 %v254_v23, %v253_v22  ;;  %v256_v26 = vld [vmem:[%s841_s5 + $0x48] sm:$0xff]  ;;  %v357_v29 = vld [vmem:[%s838_s2] ss:$0 sm:$0xff]  ;;  %v257_v34 = vld [vmem:[%s841_s5 + $0x50] sm:$0xff] }
  0x28   :  { %520 = vmatprep.subr.bf16.mxu0 %v519_v42  ;;  %v568_v27 = vpack.c.bf16 %v256_v26, %v255_v25  ;;  %v258_v35 = vld [vmem:[%s841_s5 + $0x58] sm:$0xff]  ;;  %v259_v37 = vld [vmem:[%s841_s5 + $0x60] sm:$0xff]  ;;  %v260_v38 = vld [vmem:[%s841_s5 + $0x68] sm:$0xff] }
  0x29   :  { %v571_v36 = vpack.c.bf16 %v258_v35, %v257_v34  ;;  %v574_v39 = vpack.c.bf16 %v260_v38, %v259_v37  ;;  %v261_v40 = vld [vmem:[%s841_s5 + $0x70] sm:$0xff]  ;;  %v262_v41 = vld [vmem:[%s841_s5 + $0x78] sm:$0xff]  ;;  %v358_v43 = vld [vmem:[%s840_s4] ss:$0 sm:$0xff]  ;;  %s644_s5 = smov [#allocation5]  }
  0x2a   :  { %542 = vmatpush3.bf16.msra.mxu1 %v541_v56  ;;  %v577_v42 = vpack.c.bf16 %v262_v41, %v261_v40  ;;  %v359_v48 = vld [vmem:[%s842_s6] ss:$0 sm:$0xff]  ;;  %s348_s12 = sshll.u32 %s644_s5, 4  ;;  %s349_s12 = int_to_ptr.vmem [resolvable:$true] %s348_s12 }
  0x2b   :  { %522 = vmatpush3.bf16.msra.mxu0 %v521_v50  ;;  %543 = vmatprep.subr.bf16.mxu1 %v641_v0  ;;  %s612_s13 = scalar_lea.vmem %s349_s12, 128  ;;  %p617_p9 = scmp.lt.s32.totalorder %s349_s12, %s349_s12 }
  0x2c   :  { %524 = vmatprep.subr.bf16.mxu0 %v523_v51  ;;  %p613_p8 = scmp.ne.s32.totalorder %s349_s12, %s612_s13  ;;  %p618_p10 = scmp.lt.s32.totalorder %s612_s13, %s612_s13 }
  0x2e   :  { %545 = vmatpush3.bf16.msra.mxu1 %v544_v2  ;;  %p619_p11 = por %p618_p10, %p617_p9 }
  0x2f   :  { %526 = vmatpush3.bf16.msra.mxu0 %v525_v57  ;;  %546 = vmatprep.subr.bf16.mxu1 %v641_v0 }
  0x30   :  { %528 = vmatprep.subr.bf16.mxu0 %v527_v58  ;;  %p620_p12 = pnand %p619_p11, %p613_p8 }
  0x32   :  { %548 = vmatpush3.bf16.msra.mxu1 %v547_v5 }
  0x33   :  { %530 = vmatpush3.bf16.msra.mxu0 %v529_v61  ;;  %549 = vmatprep.subr.bf16.mxu1 %v641_v0 }
  0x34   :  { %555 = vmatprep.subr.bf16.mxu0 %v641_v0 }
  0x36   :  { %147 = vmatmul.mubr.f32.vlgmr.msra.gmra.mrb[0].mxu0 %v41_v62  ;;  %551 = vmatpush3.bf16.msra.mxu1 %v550_v8 }
  0x37   :  { %496 = vmatprep.mubr.msk.f32.mxu0 %vm642_vm0, %v643_v11  ;;  %552 = vmatprep.subr.bf16.mxu1 %v641_v0 }
  0x38   :  { %557 = vmatpush3.bf16.msra.mxu0 %v556_v16 }
  0x39   :  { %558 = vmatprep.subr.bf16.mxu0 %v641_v0 }
  0x3a   :  { %554 = vmatpush3.bf16.msra.mxu1 %v553_v12 }
  0x3c   :  { %560 = vmatpush3.bf16.msra.mxu0 %v559_v18 }
  0x3d   :  { %561 = vmatprep.subr.bf16.mxu0 %v641_v0 }
  0x40   :  { %563 = vmatpush3.bf16.msra.mxu0 %v562_v21 }
  0x41   :  { %564 = vmatprep.subr.bf16.mxu0 %v641_v0 }
  0x44   :  { %566 = vmatpush3.bf16.msra.mxu0 %v565_v24 }
  0x45   :  { %567 = vmatprep.subr.bf16.mxu0 %v641_v0 }
  0x48   :  { %569 = vmatpush3.bf16.msra.mxu0 %v568_v27 }
  0x49   :  { %570 = vmatprep.subr.bf16.mxu0 %v641_v0 }
  0x4c   :  { %572 = vmatpush3.bf16.msra.mxu0 %v571_v36 }
  0x4d   :  { %573 = vmatprep.subr.bf16.mxu0 %v641_v0 }
  0x50   :  { %575 = vmatpush3.bf16.msra.mxu0 %v574_v39 }
  0x51   :  { %576 = vmatprep.subr.bf16.mxu0 %v641_v0 }
  0x54   :  { %578 = vmatpush3.bf16.msra.mxu0 %v577_v42 }
 0x109   :  { %v392_v28 = vpop.f32.mrb[0].mxu0 }
 0x10a   :  { %v393_v30 = vpop.f32.mrb[1].mxu0 }
 0x10b   :  { %v394_v31 = vadd.f32 %v393_v30, %v392_v28 }
 0x10d   :  { %v149_v32 = vadd.f32 %v394_v31, %v357_v29 }
 0x10f   :  { %586 = vtanh.f32 %v149_v32 }
 0x119   :  { %v587_v33 = vpop.eup %586 }
 0x11a   :  { %462 = vmatmul.mubr.f32.vlgmr.msra.gmra.mrb[0].mxu1 %v587_v33 }
 0x1ed   :  { %v242_v44 = vpop.f32.mrb[0].mxu1 }
 0x1ee   :  { %v243_v45 = vadd.f32 %v358_v43, %v242_v44  ;;  %v463_v46 = vpop.f32.mrb[1].mxu1 }
 0x1f0   :  { %588 = vtanh.f32 %v243_v45 }
 0x1fa   :  { %v589_v47 = vpop.eup %588 }
 0x1fb   :  { %497 = vmatmul.mubr.f32.vlgmr.msra.gmra.mrb[2].mxu0 %v589_v47 }
 0x2ce   :  { %v336_v49 = vpop.f32.mrb[2].mxu0 }
 0x2cf   :  { %v337_v0 = vadd.f32 %v359_v48, %v336_v49  ;;  %v498_v50 = vpop.f32.mrb[3].mxu0 }
 0x2d1   :  { %341 = vst.msk [vmem:[#allocation5] sm:$0xff] %vm340_vm1, %v337_v0 }
 0x2d2   :  { %623 = shalt.err (!%p620_p12)
}
 0x2d3   :  { %s624_s1 = scalar_lea.hbm %s843_s7, 128 }
 0x2d4   :  { %p625_p13 = scmp.ne.s32.totalorder %s843_s7, %s624_s1  ;;  %p628_p0 = scmp.lt.u32.totalorder %s624_s1, %s843_s7 }
 0x2d6   :  { %p630_p1 = pnand %p628_p0, %p625_p13 }
 0x2d8   :  { %633 = shalt.err (!%p630_p1)
}
 0x2d9   :  { %351 = dma.vmem_to_hbm [thread:$0]  %s349_s12, 128, %s843_s7, [#allocation4]  }
 0x2da   :  { %636 = dma.done.wait [#allocation4], 128  }
 0x2db   :  { %637 = vsyncadd [#allocation4], 4294967168 }
 0x2dc   :  { %355 = vsyncpa [#allocation3], 1 }
 0x2dd   :  { %356 = vsyncpa [#allocation4], 1 }

// kernel: tpu_custom_call.1
= control target key start
LH: loop header
LB: loop body
LE: loop exit
PB: predicated region body
PF: predicated region fallthrough
CT: control target
= control target key end

     0   :  { %12 = vsyncpa [#allocation3], 0  ;;  %s836_s0 = inlined_call_operand.vmem [shape: f32[8,256], index: 0, kind: input, shape index: {}]   ;;  %s837_s1 = inlined_call_operand.hbm [shape: f32[256,128], index: 1, kind: input, shape index: {}]   ;;  %s838_s2 = inlined_call_operand.vmem [shape: f32[1,128], index: 2, kind: input, shape index: {}]   ;;  %s839_s3 = inlined_call_operand.vmem [shape: f32[128,128], index: 3, kind: input, shape index: {}]   ;;  %s840_s4 = inlined_call_operand.vmem [shape: f32[1,128], index: 4, kind: input, shape index: {}]   ;;  %s841_s5 = inlined_call_operand.vmem [shape: f32[128,8], index: 5, kind: input, shape index: {}]   ;;  %s842_s6 = inlined_call_operand.vmem [shape: f32[1,8], index: 6, kind: input, shape index: {}]   ;;  %s843_s7 = inlined_call_operand.hbm [shape: f32[8,8], index: 7, kind: output, shape index: {}]  }
   0x1   :  { %13 = vsyncpa [#allocation4], 0  ;;  %s638_s24 = smov [#allocation2]   ;;  %s590_s28 = scalar_lea.hbm %s837_s1, 4096 }
   0x2   :  { %s21_s25 = sshll.u32 %s638_s24, 4  ;;  %p591_p0 = scmp.ne.s32.totalorder %s837_s1, %s590_s28  ;;  %s22_s25 = int_to_ptr.vmem [resolvable:$true] %s21_s25 }
   0x3   :  { %p594_p1 = scmp.lt.u32.totalorder %s590_s28, %s837_s1 }
   0x5   :  { %p596_p2 = pnand %p594_p1, %p591_p0 }
   0x7   :  { %599 = shalt.err (!%p596_p2)
}
   0x8   :  { %s600_s10 = scalar_lea.vmem %s22_s25, 4096  ;;  %p605_p4 = scmp.lt.s32.totalorder %s22_s25, %s22_s25 }
   0x9   :  { %p601_p3 = scmp.ne.s32.totalorder %s22_s25, %s600_s10  ;;  %p606_p5 = scmp.lt.s32.totalorder %s600_s10, %s600_s10 }
   0xb   :  { %p607_p6 = por %p606_p5, %p605_p4 }
   0xd   :  { %p608_p7 = pnand %p607_p6, %p601_p3 }
   0xf   :  { %611 = shalt.err (!%p608_p7)
}
  0x10   :  { %s639_s11 = smov 128   ;;  %s640_s12 = smov 8  }
  0x11   :  { %27 = dma.hbm_to_vmem [thread:$0]  %s837_s1, 4096, %s22_s25, [#allocation3], %s639_s11, %s639_s11, %s640_s12  }
  0x12   :  { %634 = dma.done.wait [#allocation3], 4096  }
  0x13   :  { %635 = vsyncadd [#allocation3], 4294963200  ;;  %v641_v0 = vmov 0.0|0.0   ;;  %v59_v1 = vld [vmem:[#allocation2 + $0x80] sm:$0xff]  ;;  %v60_v2 = vld [vmem:[#allocation2 + $0x88] sm:$0xff]  ;;  %vm642_vm0 = vmmov 0  }
  0x14   :  { %531 = vmatprep.subr.bf16.mxu1 %v641_v0  ;;  %v43_v3 = vld [vmem:[#allocation2] sm:$0xff]  ;;  %v499_v4 = vpack.c.bf16 %v60_v2, %v59_v1  ;;  %v44_v5 = vld [vmem:[#allocation2 + $0x8] sm:$0xff]  ;;  %v61_v6 = vld [vmem:[#allocation2 + $0x90] sm:$0xff]  ;;  %vm340_vm1 = vcmask 64512  }
  0x15   :  { %v62_v7 = vld [vmem:[#allocation2 + $0x98] sm:$0xff]  ;;  %v501_v8 = vpack.c.bf16 %v44_v5, %v43_v3  ;;  %v45_v10 = vld [vmem:[#allocation2 + $0x10] sm:$0xff]  ;;  %v63_v12 = vld [vmem:[#allocation2 + $0xa0] sm:$0xff] }
  0x16   :  { %v503_v9 = vpack.c.bf16 %v62_v7, %v61_v6  ;;  %v46_v11 = vld [vmem:[#allocation2 + $0x18] sm:$0xff]  ;;  %500 = vmatprep.subr.bf16.mxu0 %v499_v4  ;;  %v64_v13 = vld [vmem:[#allocation2 + $0xa8] sm:$0xff]  ;;  %v47_v16 = vld [vmem:[#allocation2 + $0x20] sm:$0xff] }
  0x17   :  { %502 = vmatpush3.bf16.msra.mxu0 %v501_v8  ;;  %v505_v14 = vpack.c.bf16 %v46_v11, %v45_v10  ;;  %v507_v15 = vpack.c.bf16 %v64_v13, %v63_v12  ;;  %v48_v17 = vld [vmem:[#allocation2 + $0x28] sm:$0xff]  ;;  %v65_v18 = vld [vmem:[#allocation2 + $0xb0] sm:$0xff]  ;;  %v66_v19 = vld [vmem:[#allocation2 + $0xb8] sm:$0xff]  ;;  %v643_v11 = vmov 0.0  }
  0x18   :  { %504 = vmatprep.subr.bf16.mxu0 %v503_v9  ;;  %v509_v20 = vpack.c.bf16 %v48_v17, %v47_v16  ;;  %v511_v21 = vpack.c.bf16 %v66_v19, %v65_v18  ;;  %v49_v22 = vld [vmem:[#allocation2 + $0x30] sm:$0xff]  ;;  %v50_v23 = vld [vmem:[#allocation2 + $0x38] sm:$0xff]  ;;  %v67_v24 = vld [vmem:[#allocation2 + $0xc0] sm:$0xff]  ;;  %461 = vmatprep.mubr.msk.f32.mxu1 %vm642_vm0, %v643_v11 }
  0x19   :  { %v68_v25 = vld [vmem:[#allocation2 + $0xc8] sm:$0xff]  ;;  %v153_v27 = vld [vmem:[%s839_s3] sm:$0xff]  ;;  %v513_v29 = vpack.c.bf16 %v50_v23, %v49_v22  ;;  %v155_v31 = vld [vmem:[%s839_s3 + $0x10] sm:$0xff] }
  0x1a   :  { %v42_v26 = vld [vmem:[%s836_s0 + $0x8] sm:$0xff]  ;;  %v156_v32 = vld [vmem:[%s839_s3 + $0x18] sm:$0xff]  ;;  %v515_v33 = vpack.c.bf16 %v68_v25, %v67_v24  ;;  %v51_v34 = vld [vmem:[#allocation2 + $0x40] sm:$0xff] }
  0x1b   :  { %506 = vmatpush3.bf16.msra.mxu0 %v505_v14  ;;  %146 = vmatprep.mubr.f32.mxu0 %v42_v26  ;;  %v154_v28 = vld [vmem:[%s839_s3 + $0x8] sm:$0xff]  ;;  %v69_v36 = vld [vmem:[#allocation2 + $0xd0] sm:$0xff]  ;;  %v70_v37 = vld [vmem:[#allocation2 + $0xd8] sm:$0xff]  ;;  %v535_v38 = vpack.c.bf16 %v156_v32, %v155_v31 }
  0x1c   :  { %508 = vmatprep.subr.bf16.mxu0 %v507_v15  ;;  %v532_v30 = vpack.c.bf16 %v154_v28, %v153_v27  ;;  %v52_v35 = vld [vmem:[#allocation2 + $0x48] sm:$0xff]  ;;  %v157_v39 = vld [vmem:[%s839_s3 + $0x20] sm:$0xff]  ;;  %v519_v42 = vpack.c.bf16 %v70_v37, %v69_v36  ;;  %v53_v43 = vld [vmem:[#allocation2 + $0x50] sm:$0xff] }
  0x1d   :  { %v158_v40 = vld [vmem:[%s839_s3 + $0x28] sm:$0xff]  ;;  %v517_v41 = vpack.c.bf16 %v52_v35, %v51_v34  ;;  %v54_v44 = vld [vmem:[#allocation2 + $0x58] sm:$0xff]  ;;  %v71_v45 = vld [vmem:[#allocation2 + $0xe0] sm:$0xff] }
  0x1e   :  { %533 = vmatpush3.bf16.msra.mxu1 %v532_v30  ;;  %v72_v46 = vld [vmem:[#allocation2 + $0xe8] sm:$0xff]  ;;  %v538_v47 = vpack.c.bf16 %v158_v40, %v157_v39  ;;  %v159_v48 = vld [vmem:[%s839_s3 + $0x30] sm:$0xff]  ;;  %v160_v49 = vld [vmem:[%s839_s3 + $0x38] sm:$0xff]  ;;  %v521_v50 = vpack.c.bf16 %v54_v44, %v53_v43 }
  0x1f   :  { %510 = vmatpush3.bf16.msra.mxu0 %v509_v20  ;;  %534 = vmatprep.subr.bf16.mxu1 %v641_v0  ;;  %v523_v51 = vpack.c.bf16 %v72_v46, %v71_v45  ;;  %v55_v52 = vld [vmem:[#allocation2 + $0x60] sm:$0xff]  ;;  %v56_v53 = vld [vmem:[#allocation2 + $0x68] sm:$0xff]  ;;  %v73_v54 = vld [vmem:[#allocation2 + $0xf0] sm:$0xff]  ;;  %v541_v56 = vpack.c.bf16 %v160_v49, %v159_v48 }
  0x20   :  { %512 = vmatprep.subr.bf16.mxu0 %v511_v21  ;;  %v74_v55 = vld [vmem:[#allocation2 + $0xf8] sm:$0xff]  ;;  %v525_v57 = vpack.c.bf16 %v56_v53, %v55_v52  ;;  %v57_v59 = vld [vmem:[#allocation2 + $0x70] sm:$0xff]  ;;  %v41_v62 = vld [vmem:[%s836_s0] sm:$0xff] }
  0x21   :  { %v527_v58 = vpack.c.bf16 %v74_v55, %v73_v54  ;;  %v58_v60 = vld [vmem:[#allocation2 + $0x78] sm:$0xff]  ;;  %v161_v63 = vld [vmem:[%s839_s3 + $0x40] sm:$0xff]  ;;  %v162_v1 = vld [vmem:[%s839_s3 + $0x48] sm:$0xff] }
  0x22   :  { %536 = vmatpush3.bf16.msra.mxu1 %v535_v38  ;;  %v529_v61 = vpack.c.bf16 %v58_v60, %v57_v59  ;;  %v544_v2 = vpack.c.bf16 %v162_v1, %v161_v63  ;;  %v163_v3 = vld [vmem:[%s839_s3 + $0x50] sm:$0xff]  ;;  %v164_v4 = vld [vmem:[%s839_s3 + $0x58] sm:$0xff]  ;;  %v165_v6 = vld [vmem:[%s839_s3 + $0x60] sm:$0xff] }
  0x23   :  { %514 = vmatpush3.bf16.msra.mxu0 %v513_v29  ;;  %537 = vmatprep.subr.bf16.mxu1 %v641_v0  ;;  %v547_v5 = vpack.c.bf16 %v164_v4, %v163_v3  ;;  %v166_v7 = vld [vmem:[%s839_s3 + $0x68] sm:$0xff]  ;;  %v167_v9 = vld [vmem:[%s839_s3 + $0x70] sm:$0xff]  ;;  %v168_v10 = vld [vmem:[%s839_s3 + $0x78] sm:$0xff] }
  0x24   :  { %516 = vmatprep.subr.bf16.mxu0 %v515_v33  ;;  %v550_v8 = vpack.c.bf16 %v166_v7, %v165_v6  ;;  %v553_v12 = vpack.c.bf16 %v168_v10, %v167_v9  ;;  %v247_v13 = vld [vmem:[%s841_s5] sm:$0xff]  ;;  %v248_v14 = vld [vmem:[%s841_s5 + $0x8] sm:$0xff]  ;;  %v249_v15 = vld [vmem:[%s841_s5 + $0x10] sm:$0xff] }
  0x25   :  { %v556_v16 = vpack.c.bf16 %v248_v14, %v247_v13  ;;  %v250_v17 = vld [vmem:[%s841_s5 + $0x18] sm:$0xff]  ;;  %v251_v19 = vld [vmem:[%s841_s5 + $0x20] sm:$0xff]  ;;  %v252_v20 = vld [vmem:[%s841_s5 + $0x28] sm:$0xff] }
  0x26   :  { %539 = vmatpush3.bf16.msra.mxu1 %v538_v47  ;;  %v559_v18 = vpack.c.bf16 %v250_v17, %v249_v15  ;;  %v562_v21 = vpack.c.bf16 %v252_v20, %v251_v19  ;;  %v253_v22 = vld [vmem:[%s841_s5 + $0x30] sm:$0xff]  ;;  %v254_v23 = vld [vmem:[%s841_s5 + $0x38] sm:$0xff]  ;;  %v255_v25 = vld [vmem:[%s841_s5 + $0x40] sm:$0xff] }
  0x27   :  { %518 = vmatpush3.bf16.msra.mxu0 %v517_v41  ;;  %540 = vmatprep.subr.bf16.mxu1 %v641_v0  ;;  %v565_v24 = vpack.c.bf16 %v254_v23, %v253_v22  ;;  %v256_v26 = vld [vmem:[%s841_s5 + $0x48] sm:$0xff]  ;;  %v357_v29 = vld [vmem:[%s838_s2] ss:$0 sm:$0xff]  ;;  %v257_v34 = vld [vmem:[%s841_s5 + $0x50] sm:$0xff] }
  0x28   :  { %520 = vmatprep.subr.bf16.mxu0 %v519_v42  ;;  %v568_v27 = vpack.c.bf16 %v256_v26, %v255_v25  ;;  %v258_v35 = vld [vmem:[%s841_s5 + $0x58] sm:$0xff]  ;;  %v259_v37 = vld [vmem:[%s841_s5 + $0x60] sm:$0xff]  ;;  %v260_v38 = vld [vmem:[%s841_s5 + $0x68] sm:$0xff] }
  0x29   :  { %v571_v36 = vpack.c.bf16 %v258_v35, %v257_v34  ;;  %v574_v39 = vpack.c.bf16 %v260_v38, %v259_v37  ;;  %v261_v40 = vld [vmem:[%s841_s5 + $0x70] sm:$0xff]  ;;  %v262_v41 = vld [vmem:[%s841_s5 + $0x78] sm:$0xff]  ;;  %v358_v43 = vld [vmem:[%s840_s4] ss:$0 sm:$0xff]  ;;  %s644_s5 = smov [#allocation5]  }
  0x2a   :  { %542 = vmatpush3.bf16.msra.mxu1 %v541_v56  ;;  %v577_v42 = vpack.c.bf16 %v262_v41, %v261_v40  ;;  %v359_v48 = vld [vmem:[%s842_s6] ss:$0 sm:$0xff]  ;;  %s348_s12 = sshll.u32 %s644_s5, 4  ;;  %s349_s12 = int_to_ptr.vmem [resolvable:$true] %s348_s12 }
  0x2b   :  { %522 = vmatpush3.bf16.msra.mxu0 %v521_v50  ;;  %543 = vmatprep.subr.bf16.mxu1 %v641_v0  ;;  %s612_s13 = scalar_lea.vmem %s349_s12, 128  ;;  %p617_p9 = scmp.lt.s32.totalorder %s349_s12, %s349_s12 }
  0x2c   :  { %524 = vmatprep.subr.bf16.mxu0 %v523_v51  ;;  %p613_p8 = scmp.ne.s32.totalorder %s349_s12, %s612_s13  ;;  %p618_p10 = scmp.lt.s32.totalorder %s612_s13, %s612_s13 }
  0x2e   :  { %545 = vmatpush3.bf16.msra.mxu1 %v544_v2  ;;  %p619_p11 = por %p618_p10, %p617_p9 }
  0x2f   :  { %526 = vmatpush3.bf16.msra.mxu0 %v525_v57  ;;  %546 = vmatprep.subr.bf16.mxu1 %v641_v0 }
  0x30   :  { %528 = vmatprep.subr.bf16.mxu0 %v527_v58  ;;  %p620_p12 = pnand %p619_p11, %p613_p8 }
  0x32   :  { %548 = vmatpush3.bf16.msra.mxu1 %v547_v5 }
  0x33   :  { %530 = vmatpush3.bf16.msra.mxu0 %v529_v61  ;;  %549 = vmatprep.subr.bf16.mxu1 %v641_v0 }
  0x34   :  { %555 = vmatprep.subr.bf16.mxu0 %v641_v0 }
  0x36   :  { %147 = vmatmul.mubr.f32.vlgmr.msra.gmra.mrb[0].mxu0 %v41_v62  ;;  %551 = vmatpush3.bf16.msra.mxu1 %v550_v8 }
  0x37   :  { %496 = vmatprep.mubr.msk.f32.mxu0 %vm642_vm0, %v643_v11  ;;  %552 = vmatprep.subr.bf16.mxu1 %v641_v0 }
  0x38   :  { %557 = vmatpush3.bf16.msra.mxu0 %v556_v16 }
  0x39   :  { %558 = vmatprep.subr.bf16.mxu0 %v641_v0 }
  0x3a   :  { %554 = vmatpush3.bf16.msra.mxu1 %v553_v12 }
  0x3c   :  { %560 = vmatpush3.bf16.msra.mxu0 %v559_v18 }
  0x3d   :  { %561 = vmatprep.subr.bf16.mxu0 %v641_v0 }
  0x40   :  { %563 = vmatpush3.bf16.msra.mxu0 %v562_v21 }
  0x41   :  { %564 = vmatprep.subr.bf16.mxu0 %v641_v0 }
  0x44   :  { %566 = vmatpush3.bf16.msra.mxu0 %v565_v24 }
  0x45   :  { %567 = vmatprep.subr.bf16.mxu0 %v641_v0 }
  0x48   :  { %569 = vmatpush3.bf16.msra.mxu0 %v568_v27 }
  0x49   :  { %570 = vmatprep.subr.bf16.mxu0 %v641_v0 }
  0x4c   :  { %572 = vmatpush3.bf16.msra.mxu0 %v571_v36 }
  0x4d   :  { %573 = vmatprep.subr.bf16.mxu0 %v641_v0 }
  0x50   :  { %575 = vmatpush3.bf16.msra.mxu0 %v574_v39 }
  0x51   :  { %576 = vmatprep.subr.bf16.mxu0 %v641_v0 }
  0x54   :  { %578 = vmatpush3.bf16.msra.mxu0 %v577_v42 }
 0x109   :  { %v392_v28 = vpop.f32.mrb[0].mxu0 }
 0x10a   :  { %v393_v30 = vpop.f32.mrb[1].mxu0 }
 0x10b   :  { %v394_v31 = vadd.f32 %v393_v30, %v392_v28 }
 0x10d   :  { %v149_v32 = vadd.f32 %v394_v31, %v357_v29 }
 0x10f   :  { %586 = vtanh.f32 %v149_v32 }
 0x119   :  { %v587_v33 = vpop.eup %586 }
 0x11a   :  { %462 = vmatmul.mubr.f32.vlgmr.msra.gmra.mrb[0].mxu1 %v587_v33 }
 0x1ed   :  { %v242_v44 = vpop.f32.mrb[0].mxu1 }
 0x1ee   :  { %v243_v45 = vadd.f32 %v358_v43, %v242_v44  ;;  %v463_v46 = vpop.f32.mrb[1].mxu1 }
 0x1f0   :  { %588 = vtanh.f32 %v243_v45 }
 0x1fa   :  { %v589_v47 = vpop.eup %588 }
 0x1fb   :  { %497 = vmatmul.mubr.f32.vlgmr.msra.gmra.mrb[2].mxu0 %v589_v47 }
 0x2ce   :  { %v336_v49 = vpop.f32.mrb[2].mxu0 }
 0x2cf   :  { %v337_v0 = vadd.f32 %v359_v48, %v336_v49  ;;  %v498_v50 = vpop.f32.mrb[3].mxu0 }
 0x2d1   :  { %341 = vst.msk [vmem:[#allocation5] sm:$0xff] %vm340_vm1, %v337_v0 }
 0x2d2   :  { %623 = shalt.err (!%p620_p12)
}
 0x2d3   :  { %s624_s1 = scalar_lea.hbm %s843_s7, 128 }
 0x2d4   :  { %p625_p13 = scmp.ne.s32.totalorder %s843_s7, %s624_s1  ;;  %p628_p0 = scmp.lt.u32.totalorder %s624_s1, %s843_s7 }
 0x2d6   :  { %p630_p1 = pnand %p628_p0, %p625_p13 }
 0x2d8   :  { %633 = shalt.err (!%p630_p1)
}
 0x2d9   :  { %351 = dma.vmem_to_hbm [thread:$0]  %s349_s12, 128, %s843_s7, [#allocation4]  }
 0x2da   :  { %636 = dma.done.wait [#allocation4], 128  }
 0x2db   :  { %637 = vsyncadd [#allocation4], 4294967168 }
 0x2dc   :  { %355 = vsyncpa [#allocation3], 1 }
 0x2dd   :  { %356 = vsyncpa [#allocation4], 1 }

</bundles_post_ra>
